<compile_context>
chip_gen: v6e
topology: v6e:2x2x1
jax: 0.10.0
libtpu: 0.0.40
codegen_flags: <defaults>
</compile_context>

<pallas_src>
import jax
import jax.numpy as jnp
from jax.experimental import pallas as pl
from jax.experimental.pallas import tpu as pltpu


def _round_up(x, m):
    return (x + m - 1) // m * m


def fused_mlp_kernel(a_ref, x_ref, w_ref, b_ref, o_ref):
    """Push one row tile through the whole MLP.

    a_ref : (L,)      f32 SMEM  -- per-layer WaveAct amplitude A = sqrt(w1^2+w2^2)
    x_ref : (tm, D)   f32 VMEM  -- input row tile (features zero-padded to D)
    w_ref : (L, D, D) f32 VMEM  -- stacked, transposed, zero-padded layer weights
    b_ref : (L, 1, D) f32 VMEM  -- stacked biases with WaveAct phase folded in (b + phi)
    o_ref : (tm, D)   f32 VMEM  -- output row tile (first d_output lanes are real)
    """
    num_layers = w_ref.shape[0]
    h = x_ref[...]
    for l in range(num_layers):  # static unroll: L is small (default 3)
        z = jnp.dot(h, w_ref[l], preferred_element_type=jnp.float32) + b_ref[l]
        # WaveAct: w1*sin(z) + w2*cos(z) == A*sin(z + phi); phi already in bias.
        h = a_ref[l] * jnp.sin(z)
    o_ref[...] = h


def _pack_params(params, D):
    """Stack torch-layout layer params into padded, kernel-ready tensors."""
    L = len(params)
    w_stack = jnp.zeros((L, D, D), jnp.float32)
    b_stack = jnp.zeros((L, 1, D), jnp.float32)
    a_stack = jnp.zeros((L,), jnp.float32)
    for l, (w, b, w1, w2) in enumerate(params):
        d_out, d_in = w.shape
        amp = jnp.sqrt(w1 * w1 + w2 * w2)
        phi = jnp.arctan2(w2, w1)
        w_stack = w_stack.at[l, :d_in, :d_out].set(w.T.astype(jnp.float32))
        b_stack = b_stack.at[l, 0, :d_out].set(b.astype(jnp.float32) + phi)
        a_stack = a_stack.at[l].set(amp)
    return a_stack, w_stack, b_stack


def mlp_forward(x, params, *, tm=256, interpret=False):
    """Fused MLP forward: h_{l+1} = WaveAct(h_l @ W_l^T + b_l) for all layers."""
    N, d_in0 = x.shape
    d_out_final = params[-1][0].shape[0]
    L = len(params)

    # Common padded feature width: lane-dense (multiple of 128) for every layer.
    D = _round_up(max([d_in0] + [p[0].shape[0] for p in params]), 128)

    # Row tiling: multiple of 8 sublanes, big tiles by default.
    n_pad8 = _round_up(N, 8)
    tm_eff = min(tm, n_pad8)
    n_pad = _round_up(n_pad8, tm_eff)
    grid = (n_pad // tm_eff,)

    a_stack, w_stack, b_stack = _pack_params(params, D)
    x_pad = jnp.zeros((n_pad, D), jnp.float32).at[:N, :d_in0].set(
        x.astype(jnp.float32))

    # VMEM budget: double-buffered x/out tiles + resident weights/biases + slack,
    # capped at 64 MiB (v7x physical VMEM per TC).
    est = (2 * tm_eff * D * 4) * 2 + 2 * L * D * D * 4 + 2 * L * D * 4 + (1 << 20)
    vmem_limit = int(min(max(2 * est, 16 * 1024 * 1024), 64 * 1024 * 1024))

    out = pl.pallas_call(
        fused_mlp_kernel,
        out_shape=jax.ShapeDtypeStruct((n_pad, D), jnp.float32),
        grid=grid,
        in_specs=[
            pl.BlockSpec(memory_space=pltpu.MemorySpace.SMEM),   # A per layer (scalars)
            pl.BlockSpec((tm_eff, D), lambda i: (i, 0)),         # x row tile
            pl.BlockSpec((L, D, D), lambda i: (0, 0, 0)),        # all weights, resident
            pl.BlockSpec((L, 1, D), lambda i: (0, 0, 0)),        # all biases (+phi), resident
        ],
        out_specs=pl.BlockSpec((tm_eff, D), lambda i: (i, 0)),
        compiler_params=pltpu.CompilerParams(
            dimension_semantics=("parallel",),
            vmem_limit_bytes=vmem_limit,
        ),
        interpret=interpret,
    )(a_stack, x_pad, w_stack, b_stack)

    return out[:N, :d_out_final]


def init_mlp_params(key, d_input, d_output, d_ff=256, num_layers=3):
    """Mirror the torch MLP's layer structure exactly (incl. its `num_layers > 2` guard).

    Each entry: (W (d_out, d_in), b (d_out,), wave_w1 scalar, wave_w2 scalar).
    """
    dims = [(d_input, d_ff)]
    for _ in range(num_layers - 2):
        dims.append((d_ff, d_ff))
    if num_layers > 2:  # matches the reference nn.Module
        dims.append((d_ff, d_output))
    params = []
    for (d_in, d_out) in dims:
        key, kw, kb = jax.random.split(key, 3)
        bound = 1.0 / (d_in ** 0.5)  # torch Linear default init scale
        w = jax.random.uniform(kw, (d_out, d_in), jnp.float32, -bound, bound)
        b = jax.random.uniform(kb, (d_out,), jnp.float32, -bound, bound)
        w1 = jnp.asarray(1.0, jnp.float32)  # WaveAct params init to 1.0
        w2 = jnp.asarray(1.0, jnp.float32)
        params.append((w, b, w1, w2))
    return params


def mlp_forward_ref(x, params):
    h = x
    for (w, b, w1, w2) in params:
        z = h @ w.T + b
        h = w1 * jnp.sin(z) + w2 * jnp.cos(z)
    return h


if __name__ == "__main__":
    key = jax.random.PRNGKey(0)
    d_input, d_output, d_ff, num_layers = 4, 3, 32, 3
    batch = 16

    kp, kx = jax.random.split(key)
    params = init_mlp_params(kp, d_input, d_output, d_ff=d_ff, num_layers=num_layers)
    x = jax.random.normal(kx, (batch, d_input), jnp.float32)

    ref = mlp_forward_ref(x, params)

    # Default large row tile (single grid step at this tiny batch).
    out = jax.block_until_ready(mlp_forward(x, params))
    assert out.shape == (batch, d_output)
    assert jnp.allclose(out, ref, atol=1e-5, rtol=1e-5)

    # Small tile to also exercise the multi-tile (grid > 1) path.
    out_tiled = jax.block_until_ready(mlp_forward(x, params, tm=8))
    assert jnp.allclose(out_tiled, ref, atol=1e-5, rtol=1e-5)

    print("KERNEL_OK")
</pallas_src>

<mosaic_0001>
module attributes {stable_mosaic.version = 11 : i64} {
  func.func @fused_mlp_kernel(%arg0: i32, %arg1: memref<3xf32, #tpu.memory_space<smem>>, %arg2: memref<16x128xf32, #tpu.memory_space<vmem>>, %arg3: memref<3x128x128xf32, #tpu.memory_space<vmem>>, %arg4: memref<3x1x128xf32, #tpu.memory_space<vmem>>, %arg5: memref<16x128xf32, #tpu.memory_space<vmem>>) attributes {dimension_semantics = [#tpu.dimension_semantics<parallel>], iteration_bounds = array<i64: 1>, scalar_prefetch = 0 : i64, scratch_operands = 0 : i64, tpu.core_type = #tpu.core_type<tc>, window_params = [{transform_indices = @transform_0, window_bounds = array<i64: 3>}, {transform_indices = @transform_1, window_bounds = array<i64: 16, 128>}, {pipeline_mode = #tpu.pipeline_mode<synchronous>, transform_indices = @transform_2, window_bounds = array<i64: 3, 128, 128>}, {pipeline_mode = #tpu.pipeline_mode<synchronous>, transform_indices = @transform_3, window_bounds = array<i64: 3, 1, 128>}, {transform_indices = @transform_4, window_bounds = array<i64: 16, 128>}]} {
    %c0 = arith.constant 0 : index
    %c0_0 = arith.constant 0 : index
    %0 = vector.load %arg2[%c0, %c0_0] : memref<16x128xf32, #tpu.memory_space<vmem>>, vector<16x128xf32>
    %c0_1 = arith.constant 0 : index
    %c0_2 = arith.constant 0 : index
    %c0_3 = arith.constant 0 : index
    %1 = vector.load %arg3[%c0_1, %c0_2, %c0_3] : memref<3x128x128xf32, #tpu.memory_space<vmem>>, vector<1x128x128xf32>
    %2 = vector.shape_cast %1 : vector<1x128x128xf32> to vector<128x128xf32>
    %cst = arith.constant dense<0.000000e+00> : vector<16x128xf32>
    %3 = tpu.matmul %0, %2, %cst {dimension_numbers = #tpu.dot_dimension_numbers<[1], [0], [0], [1], [0, 0, 1, 1], [], []>} : vector<16x128xf32>, vector<128x128xf32>, vector<16x128xf32> -> vector<16x128xf32>
    %c0_4 = arith.constant 0 : index
    %c0_5 = arith.constant 0 : index
    %c0_6 = arith.constant 0 : index
    %4 = vector.load %arg4[%c0_4, %c0_5, %c0_6] : memref<3x1x128xf32, #tpu.memory_space<vmem>>, vector<1x1x128xf32>
    %5 = vector.shape_cast %4 : vector<1x1x128xf32> to vector<1x128xf32>
    %6 = vector.broadcast %5 : vector<1x128xf32> to vector<16x128xf32>
    %7 = arith.addf %3, %6 : vector<16x128xf32>
    %c0_7 = arith.constant 0 : index
    %8 = memref.load %arg1[%c0_7] : memref<3xf32, #tpu.memory_space<smem>>
    %9 = math.sin %7 : vector<16x128xf32>
    %10 = vector.broadcast %8 : f32 to vector<16x128xf32>
    %11 = arith.mulf %10, %9 : vector<16x128xf32>
    %c1 = arith.constant 1 : index
    %c0_8 = arith.constant 0 : index
    %c0_9 = arith.constant 0 : index
    %12 = vector.load %arg3[%c1, %c0_8, %c0_9] : memref<3x128x128xf32, #tpu.memory_space<vmem>>, vector<1x128x128xf32>
    %13 = vector.shape_cast %12 : vector<1x128x128xf32> to vector<128x128xf32>
    %cst_10 = arith.constant dense<0.000000e+00> : vector<16x128xf32>
    %14 = tpu.matmul %11, %13, %cst_10 {dimension_numbers = #tpu.dot_dimension_numbers<[1], [0], [0], [1], [0, 0, 1, 1], [], []>} : vector<16x128xf32>, vector<128x128xf32>, vector<16x128xf32> -> vector<16x128xf32>
    %c1_11 = arith.constant 1 : index
    %c0_12 = arith.constant 0 : index
    %c0_13 = arith.constant 0 : index
    %15 = vector.load %arg4[%c1_11, %c0_12, %c0_13] : memref<3x1x128xf32, #tpu.memory_space<vmem>>, vector<1x1x128xf32>
    %16 = vector.shape_cast %15 : vector<1x1x128xf32> to vector<1x128xf32>
    %17 = vector.broadcast %16 : vector<1x128xf32> to vector<16x128xf32>
    %18 = arith.addf %14, %17 : vector<16x128xf32>
    %c1_14 = arith.constant 1 : index
    %19 = memref.load %arg1[%c1_14] : memref<3xf32, #tpu.memory_space<smem>>
    %20 = math.sin %18 : vector<16x128xf32>
    %21 = vector.broadcast %19 : f32 to vector<16x128xf32>
    %22 = arith.mulf %21, %20 : vector<16x128xf32>
    %c2 = arith.constant 2 : index
    %c0_15 = arith.constant 0 : index
    %c0_16 = arith.constant 0 : index
    %23 = vector.load %arg3[%c2, %c0_15, %c0_16] : memref<3x128x128xf32, #tpu.memory_space<vmem>>, vector<1x128x128xf32>
    %24 = vector.shape_cast %23 : vector<1x128x128xf32> to vector<128x128xf32>
    %cst_17 = arith.constant dense<0.000000e+00> : vector<16x128xf32>
    %25 = tpu.matmul %22, %24, %cst_17 {dimension_numbers = #tpu.dot_dimension_numbers<[1], [0], [0], [1], [0, 0, 1, 1], [], []>} : vector<16x128xf32>, vector<128x128xf32>, vector<16x128xf32> -> vector<16x128xf32>
    %c2_18 = arith.constant 2 : index
    %c0_19 = arith.constant 0 : index
    %c0_20 = arith.constant 0 : index
    %26 = vector.load %arg4[%c2_18, %c0_19, %c0_20] : memref<3x1x128xf32, #tpu.memory_space<vmem>>, vector<1x1x128xf32>
    %27 = vector.shape_cast %26 : vector<1x1x128xf32> to vector<1x128xf32>
    %28 = vector.broadcast %27 : vector<1x128xf32> to vector<16x128xf32>
    %29 = arith.addf %25, %28 : vector<16x128xf32>
    %c2_21 = arith.constant 2 : index
    %30 = memref.load %arg1[%c2_21] : memref<3xf32, #tpu.memory_space<smem>>
    %31 = math.sin %29 : vector<16x128xf32>
    %32 = vector.broadcast %30 : f32 to vector<16x128xf32>
    %33 = arith.mulf %32, %31 : vector<16x128xf32>
    %c0_22 = arith.constant 0 : index
    %c0_23 = arith.constant 0 : index
    %34 = vector.load %arg5[%c0_22, %c0_23] : memref<16x128xf32, #tpu.memory_space<vmem>>, vector<16x128xf32>
    tpu.vector_store %arg5[%c0_22, %c0_23], %33 {strides = array<i32>} : memref<16x128xf32, #tpu.memory_space<vmem>>, vector<16x128xf32>,
    return
  }
  func.func @transform_0(%arg0: i32) -> i32 {
    %c0_i32 = arith.constant 0 : i32
    %c0_i32_0 = arith.constant 0 : i32
    return %c0_i32 : i32
  }
  func.func @transform_1(%arg0: i32) -> (i32, i32) {
    %c0_i32 = arith.constant 0 : i32
    %c0_i32_0 = arith.constant 0 : i32
    return %arg0, %c0_i32 : i32, i32
  }
  func.func @transform_2(%arg0: i32) -> (i32, i32, i32) {
    %c0_i32 = arith.constant 0 : i32
    %c0_i32_0 = arith.constant 0 : i32
    %c0_i32_1 = arith.constant 0 : i32
    %c0_i32_2 = arith.constant 0 : i32
    return %c0_i32, %c0_i32_0, %c0_i32_1 : i32, i32, i32
  }
  func.func @transform_3(%arg0: i32) -> (i32, i32, i32) {
    %c0_i32 = arith.constant 0 : i32
    %c0_i32_0 = arith.constant 0 : i32
    %c0_i32_1 = arith.constant 0 : i32
    %c0_i32_2 = arith.constant 0 : i32
    return %c0_i32, %c0_i32_0, %c0_i32_1 : i32, i32, i32
  }
  func.func @transform_4(%arg0: i32) -> (i32, i32) {
    %c0_i32 = arith.constant 0 : i32
    %c0_i32_0 = arith.constant 0 : i32
    return %arg0, %c0_i32 : i32, i32
  }
}

</mosaic_0001>

<bundles_post_ra>
// kernel: tpu_custom_call.1
= control target key start
LH: loop header
LB: loop body
LE: loop exit
PB: predicated region body
PF: predicated region fallthrough
CT: control target
= control target key end

     0   :  { %9 = vsyncpa [#allocation5], 0  ;;  %s1677_s0 = inlined_call_operand.hbm [shape: f32[3], index: 0, kind: input, shape index: {}]   ;;  %s1678_s1 = inlined_call_operand.hbm [shape: f32[16,128], index: 1, kind: input, shape index: {}]   ;;  %s1679_s2 = inlined_call_operand.hbm [shape: f32[3,128,128], index: 2, kind: input, shape index: {}]   ;;  %s1680_s3 = inlined_call_operand.vmem [shape: f32[3,1,128], index: 3, kind: input, shape index: {}]   ;;  %s1681_s4 = inlined_call_operand.hbm [shape: f32[16,128], index: 4, kind: output, shape index: {}]  }
   0x1   :  { %10 = vsyncpa [#allocation3], 0 }
   0x2   :  { %11 = vsyncpa [#allocation8], 0 }
   0x3   :  { %12 = vsyncpa [#allocation4], 0  ;;  %s1340_s15 = smov [#allocation2]   ;;  %s1341_s18 = smov [#allocation6]  }
   0x4   :  { %20 = dma.hbm_to_smem %s1677_s0, 16, %s1340_s15, [#allocation5]  }
   0x5   :  { %s26_s19 = sshll.u32 %s1341_s18, 4  ;;  %s27_s19 = int_to_ptr.vmem [resolvable:$true] %s26_s19 }
   0x6   :  { %s1280_s20 = scalar_lea.vmem %s27_s19, 256  ;;  %p1285_p1 = scmp.lt.s32.totalorder %s27_s19, %s27_s19 }
   0x7   :  { %p1281_p0 = scmp.ne.s32.totalorder %s27_s19, %s1280_s20  ;;  %p1286_p2 = scmp.lt.s32.totalorder %s1280_s20, %s1280_s20 }
   0x9   :  { %p1287_p3 = por %p1286_p2, %p1285_p1 }
   0xb   :  { %p1288_p4 = pnand %p1287_p3, %p1281_p0 }
   0xd   :  { %1291 = shalt.err (!%p1288_p4)
}
   0xe   :  { %s1342_s21 = smov 128   ;;  %s1343_s22 = smov 8  }
   0xf   :  { %32 = dma.hbm_to_vmem [thread:$0]  %s1678_s1, 256, %s27_s19, [#allocation3], %s1342_s21, %s1342_s21, %s1343_s22  }
  0x10   :  { %s1344_s0 = smov [#allocation7]  }
  0x11   :  { %s38_s25 = sshll.u32 %s1344_s0, 4  ;;  %s39_s25 = int_to_ptr.vmem [resolvable:$true] %s38_s25 }
  0x12   :  { %s1300_s26 = scalar_lea.vmem %s39_s25, 6144  ;;  %p1305_p6 = scmp.lt.s32.totalorder %s39_s25, %s39_s25 }
  0x13   :  { %p1301_p5 = scmp.ne.s32.totalorder %s39_s25, %s1300_s26  ;;  %p1306_p7 = scmp.lt.s32.totalorder %s1300_s26, %s1300_s26 }
  0x15   :  { %p1307_p8 = por %p1306_p7, %p1305_p6 }
  0x17   :  { %p1308_p9 = pnand %p1307_p8, %p1301_p5 }
  0x19   :  { %1311 = shalt.err (!%p1308_p9)
}
  0x1a   :  { %44 = dma.hbm_to_vmem [thread:$0]  %s1679_s2, 6144, %s39_s25, [#allocation8], %s1342_s21, %s1342_s21, %s1343_s22  }
  0x1b   :  { %1332 = dma.done.wait [#allocation5], 16  }
  0x1c   :  { %1333 = vsyncadd [#allocation5], 4294967280 }
  0x1d   :  { %1334 = dma.done.wait [#allocation3], 256  }
  0x1e   :  { %1335 = vsyncadd [#allocation3], 4294967040 }
  0x1f   :  { %1336 = dma.done.wait [#allocation8], 6144  }
  0x20   :  { %1337 = vsyncadd [#allocation8], 4294961152 }
  0x21   :  { %56 = sfence }
  0x22   :  { %v74_v0 = vld [vmem:[#allocation7 + $0x78] sm:$0xff]  ;;  %v73_v1 = vld [vmem:[#allocation7 + $0x70] sm:$0xff]  ;;  %v72_v2 = vld [vmem:[#allocation7 + $0x68] sm:$0xff]  ;;  %v1345_v56 = vmov 683565275   ;;  %s157_s29 = sld [smem:[#allocation2]] }
  0x23   :  { %1099 = vmatprep.subr.mxu0 %v74_v0  ;;  %v71_v3 = vld [vmem:[#allocation7 + $0x60] sm:$0xff]  ;;  %v57_v4 = vld [vmem:[#allocation6] sm:$0xff]  ;;  %v70_v5 = vld [vmem:[#allocation7 + $0x58] sm:$0xff]  ;;  %v1346_v60 = vmov 2475754826   ;;  %s1025_s6 = sld [smem:[#allocation2 + $0x1]] }
  0x24   :  { %1100 = vmatpush3.msra.mxu0 %v74_v0  ;;  %1131 = vmatprep.mubr.f32.mxu0 %v57_v4  ;;  %v69_v6 = vld [vmem:[#allocation7 + $0x50] sm:$0xff]  ;;  %v68_v7 = vld [vmem:[#allocation7 + $0x48] sm:$0xff]  ;;  %v67_v8 = vld [vmem:[#allocation7 + $0x40] sm:$0xff]  ;;  %v1347_v62 = vmov 2131351028   ;;  %s1351_s9 = smov [#allocation9]  }
  0x25   :  { %1101 = vmatprep.subr.mxu0 %v73_v1  ;;  %v66_v9 = vld [vmem:[#allocation7 + $0x38] sm:$0xff]  ;;  %v65_v10 = vld [vmem:[#allocation7 + $0x30] sm:$0xff]  ;;  %v64_v11 = vld [vmem:[#allocation7 + $0x28] sm:$0xff]  ;;  %v1348_v0 = vmov 2102212464   ;;  %s1000_s10 = sshll.u32 %s1351_s9, 4  ;;  %s1001_s10 = int_to_ptr.vmem [resolvable:$true] %s1000_s10 }
  0x26   :  { %1102 = vmatpush3.msra.mxu0 %v73_v1  ;;  %v63_v12 = vld [vmem:[#allocation7 + $0x20] sm:$0xff]  ;;  %v62_v13 = vld [vmem:[#allocation7 + $0x18] sm:$0xff]  ;;  %v61_v14 = vld [vmem:[#allocation7 + $0x10] sm:$0xff]  ;;  %s1312_s11 = scalar_lea.vmem %s1001_s10, 256  ;;  %p1317_p11 = scmp.lt.s32.totalorder %s1001_s10, %s1001_s10 }
  0x27   :  { %1103 = vmatprep.subr.mxu0 %v72_v2  ;;  %v60_v15 = vld [vmem:[#allocation7 + $0x8] sm:$0xff]  ;;  %v59_v16 = vld [vmem:[#allocation7] sm:$0xff]  ;;  %v58_v17 = vld [vmem:[#allocation6 + $0x8] sm:$0xff]  ;;  %p1313_p10 = scmp.ne.s32.totalorder %s1001_s10, %s1312_s11  ;;  %p1318_p12 = scmp.lt.s32.totalorder %s1312_s11, %s1312_s11 }
  0x28   :  { %1104 = vmatpush3.msra.mxu0 %v72_v2  ;;  %v385_v18 = vld [vmem:[#allocation7 + $0xf8] sm:$0xff]  ;;  %v384_v19 = vld [vmem:[#allocation7 + $0xf0] sm:$0xff]  ;;  %v383_v20 = vld [vmem:[#allocation7 + $0xe8] sm:$0xff]  ;;  %v1349_v2 = vmov 920167782  }
  0x29   :  { %1105 = vmatprep.subr.mxu0 %v71_v3  ;;  %1134 = vmatprep.subr.mxu1 %v385_v18  ;;  %v382_v21 = vld [vmem:[#allocation7 + $0xe0] sm:$0xff]  ;;  %v381_v22 = vld [vmem:[#allocation7 + $0xd8] sm:$0xff]  ;;  %v380_v23 = vld [vmem:[#allocation7 + $0xd0] sm:$0xff]  ;;  %p1319_p13 = por %p1318_p12, %p1317_p11 }
  0x2a   :  { %1106 = vmatpush3.msra.mxu0 %v71_v3  ;;  %1135 = vmatpush3.msra.mxu1 %v385_v18  ;;  %v379_v24 = vld [vmem:[#allocation7 + $0xc8] sm:$0xff]  ;;  %v378_v25 = vld [vmem:[#allocation7 + $0xc0] sm:$0xff]  ;;  %v377_v26 = vld [vmem:[#allocation7 + $0xb8] sm:$0xff] }
  0x2b   :  { %1107 = vmatprep.subr.mxu0 %v70_v5  ;;  %1136 = vmatprep.subr.mxu1 %v384_v19  ;;  %v376_v27 = vld [vmem:[#allocation7 + $0xb0] sm:$0xff]  ;;  %v375_v28 = vld [vmem:[#allocation7 + $0xa8] sm:$0xff]  ;;  %v374_v29 = vld [vmem:[#allocation7 + $0xa0] sm:$0xff]  ;;  %p1320_p0 = pnand %p1319_p13, %p1313_p10 }
  0x2c   :  { %1108 = vmatpush3.msra.mxu0 %v70_v5  ;;  %1137 = vmatpush3.msra.mxu1 %v384_v19  ;;  %v373_v30 = vld [vmem:[#allocation7 + $0x98] sm:$0xff]  ;;  %v372_v31 = vld [vmem:[#allocation7 + $0x90] sm:$0xff]  ;;  %v371_v32 = vld [vmem:[#allocation7 + $0x88] sm:$0xff] }
  0x2d   :  { %1109 = vmatprep.subr.mxu0 %v69_v6  ;;  %1138 = vmatprep.subr.mxu1 %v383_v20  ;;  %v370_v33 = vld [vmem:[#allocation7 + $0x80] sm:$0xff]  ;;  %v1014_v34 = vld [vmem:[%s1680_s3] ss:$0 sm:$0xff] }
  0x2e   :  { %1110 = vmatpush3.msra.mxu0 %v69_v6  ;;  %1139 = vmatpush3.msra.mxu1 %v383_v20 }
  0x2f   :  { %1111 = vmatprep.subr.mxu0 %v68_v7  ;;  %1140 = vmatprep.subr.mxu1 %v382_v21 }
  0x30   :  { %1112 = vmatpush3.msra.mxu0 %v68_v7  ;;  %1141 = vmatpush3.msra.mxu1 %v382_v21 }
  0x31   :  { %1113 = vmatprep.subr.mxu0 %v67_v8  ;;  %1142 = vmatprep.subr.mxu1 %v381_v22 }
  0x32   :  { %1114 = vmatpush3.msra.mxu0 %v67_v8  ;;  %1143 = vmatpush3.msra.mxu1 %v381_v22 }
  0x33   :  { %1115 = vmatprep.subr.mxu0 %v66_v9  ;;  %1144 = vmatprep.subr.mxu1 %v380_v23 }
  0x34   :  { %1116 = vmatpush3.msra.mxu0 %v66_v9  ;;  %1145 = vmatpush3.msra.mxu1 %v380_v23  ;;  %v1350_v9 = vmov 1326507024  }
  0x35   :  { %1117 = vmatprep.subr.mxu0 %v65_v10  ;;  %1146 = vmatprep.subr.mxu1 %v379_v24 }
  0x36   :  { %1118 = vmatpush3.msra.mxu0 %v65_v10  ;;  %1147 = vmatpush3.msra.mxu1 %v379_v24 }
  0x37   :  { %1119 = vmatprep.subr.mxu0 %v64_v11  ;;  %1148 = vmatprep.subr.mxu1 %v378_v25 }
  0x38   :  { %1120 = vmatpush3.msra.mxu0 %v64_v11  ;;  %1149 = vmatpush3.msra.mxu1 %v378_v25 }
  0x39   :  { %1121 = vmatprep.subr.mxu0 %v63_v12  ;;  %1150 = vmatprep.subr.mxu1 %v377_v26 }
  0x3a   :  { %1122 = vmatpush3.msra.mxu0 %v63_v12  ;;  %1151 = vmatpush3.msra.mxu1 %v377_v26 }
  0x3b   :  { %1123 = vmatprep.subr.mxu0 %v62_v13  ;;  %1152 = vmatprep.subr.mxu1 %v376_v27 }
  0x3c   :  { %1124 = vmatpush3.msra.mxu0 %v62_v13  ;;  %1153 = vmatpush3.msra.mxu1 %v376_v27 }
  0x3d   :  { %1125 = vmatprep.subr.mxu0 %v61_v14  ;;  %1154 = vmatprep.subr.mxu1 %v375_v28 }
  0x3e   :  { %1126 = vmatpush3.msra.mxu0 %v61_v14  ;;  %1155 = vmatpush3.msra.mxu1 %v375_v28 }
  0x3f   :  { %1127 = vmatprep.subr.mxu0 %v60_v15  ;;  %1156 = vmatprep.subr.mxu1 %v374_v29 }
  0x40   :  { %1128 = vmatpush3.msra.mxu0 %v60_v15  ;;  %1157 = vmatpush3.msra.mxu1 %v374_v29 }
  0x41   :  { %1129 = vmatprep.subr.mxu0 %v59_v16  ;;  %1158 = vmatprep.subr.mxu1 %v373_v30 }
  0x42   :  { %1130 = vmatpush3.msra.mxu0 %v59_v16  ;;  %1159 = vmatpush3.msra.mxu1 %v373_v30 }
  0x43   :  { %1132 = vmatmul.mubr.f32.vlgmr.msra.gmra.mxu0 %v58_v17  ;;  %1160 = vmatprep.subr.mxu1 %v372_v31 }
  0x44   :  { %1161 = vmatpush3.msra.mxu1 %v372_v31 }
  0x45   :  { %1162 = vmatprep.subr.mxu1 %v371_v32 }
  0x46   :  { %1163 = vmatpush3.msra.mxu1 %v371_v32 }
  0x47   :  { %1164 = vmatprep.subr.mxu1 %v370_v33 }
  0x48   :  { %1165 = vmatpush3.msra.mxu1 %v370_v33 }
 0x103   :  { %v1133_v35 = vpop.f32.mrf.mxu0 }
 0x104   :  { %v1395_v36 = vadd.f32 %v1133_v35, %v1014_v34 }
 0x105   :  { %v148_v37 = vpop.f32.mrf.mxu0 }
 0x106   :  { %v262_v38 = vand.u32 2147483647, %v1395_v36  ;;  %v265_v39 = vand.u32 2139095040, %v1395_v36  ;;  %v1399_v40 = vadd.f32 %v1014_v34, %v148_v37  ;;  %vm264_vm14 = vcmp.lt.s32.totalorder %v1395_v36, 0 }
 0x108   :  { %v266_v41 = vshrl.u32 %v265_v39, 23  ;;  %v161_v42 = vand.u32 2139095040, %v1399_v40  ;;  %v269_v44 = vand.u32 8388607, %v262_v38  ;;  %v158_v48 = vand.u32 2147483647, %v1399_v40 }
 0x109   :  { %vm1477_vm15 = vcmp.le.f32.partialorder %v262_v38, 0.7853982 }
 0x10a   :  { %v1019_v43 = vadd.s32 4294967169, %v266_v41  ;;  %v162_v45 = vshrl.u32 %v161_v42, 23  ;;  %v270_v49 = vor.u32 8388608, %v269_v44  ;;  %v1407_v54 = vand.u32 8388607, %v158_v48 }
 0x10c   :  { %v272_v46 = vadd.s32 1, %v1019_v43  ;;  %v1015_v47 = vadd.s32 4294967169, %v162_v45  ;;  %v1410_v58 = vshll.u32 %v270_v49, 8  ;;  %v166_v43 = vor.u32 8388608, %v1407_v54 }
 0x10e   :  { %vm273_vm0 = vcmp.gt.s32.totalorder %v272_v46, 0  ;;  %v168_v50 = vadd.s32 1, %v1015_v47 }
 0x10f   :  { %v274_v51 = vsel %vm273_vm0, %v272_v46, 0  ;;  %vm160_vm0 = vcmp.lt.s32.totalorder %v1399_v40, 0 }
 0x110   :  { %v275_v52 = vshrl.u32 %v274_v51, 5  ;;  %v276_v53 = vand.u32 31, %v274_v51  ;;  %vm169_vm1 = vcmp.gt.s32.totalorder %v168_v50, 0 }
 0x111   :  { %v170_v59 = vsel %vm169_vm1, %v168_v50, 0  ;;  %vm159_vm1 = vcmp.le.f32.partialorder %v158_v48, 0.7853982 }
 0x112   :  { %v277_v55 = vsub.s32 32, %v276_v53  ;;  %v279_v57 = vshll.u32 %v1345_v56, %v276_v53  ;;  %v282_v61 = vshll.u32 %v1346_v60, %v276_v53  ;;  %v285_v63 = vshll.u32 %v1347_v62, %v276_v53 }
 0x113   :  { %v288_v1 = vshll.u32 %v1348_v0, %v276_v53  ;;  %v291_v3 = vshll.u32 %v1349_v2, %v276_v53  ;;  %vm294_vm2 = vcmp.lt.s32.totalorder %v275_v52, 1  ;;  %vm295_vm3 = vcmp.lt.s32.totalorder %v275_v52, 2 }
 0x114   :  { %v280_v4 = vshrl.u32 %v1346_v60, %v277_v55  ;;  %v283_v5 = vshrl.u32 %v1347_v62, %v277_v55  ;;  %v286_v6 = vshrl.u32 %v1348_v0, %v277_v55  ;;  %v278_v7 = vshrl.u32 %v1345_v56, %v277_v55 }
 0x115   :  { %v289_v8 = vshrl.u32 %v1349_v2, %v277_v55  ;;  %v292_v10 = vshrl.u32 %v1350_v9, %v277_v55  ;;  %vm296_vm4 = vcmp.lt.s32.totalorder %v275_v52, 3  ;;  %vm297_vm5 = vcmp.lt.s32.totalorder %v275_v52, 4 }
 0x116   :  { %v281_v11 = vor.u32 %v280_v4, %v279_v57  ;;  %v284_v12 = vor.u32 %v283_v5, %v282_v61  ;;  %v287_v13 = vor.u32 %v286_v6, %v285_v63  ;;  %v172_v16 = vand.u32 31, %v170_v59 }
 0x117   :  { %v290_v14 = vor.u32 %v289_v8, %v288_v1  ;;  %v293_v15 = vor.u32 %v292_v10, %v291_v3  ;;  %v171_v28 = vshrl.u32 %v170_v59, 5  ;;  %v206_v5 = vshll.u32 %v166_v43, 8 }
 0x118   :  { %v298_v17 = vsel %vm294_vm2, %v278_v7, %v281_v11  ;;  %v299_v18 = vsel %vm297_vm5, %v287_v13, 2102212464  ;;  %v302_v19 = vsel %vm294_vm2, %v281_v11, %v284_v12  ;;  %v306_v20 = vsel %vm294_vm2, %v284_v12, %v287_v13 }
 0x119   :  { %v300_v21 = vsel %vm296_vm4, %v284_v12, %v299_v18  ;;  %v303_v22 = vsel %vm297_vm5, %v290_v14, 920167782  ;;  %v307_v23 = vsel %vm297_vm5, %v293_v15, 1326507024  ;;  %v173_v24 = vsub.s32 32, %v172_v16 }
 0x11a   :  { %v301_v25 = vsel %vm295_vm3, %v298_v17, %v300_v21  ;;  %v304_v26 = vsel %vm296_vm4, %v287_v13, %v303_v22  ;;  %v308_v27 = vsel %vm296_vm4, %v290_v14, %v307_v23  ;;  %v184_v31 = vshll.u32 %v1348_v0, %v172_v16 }
 0x11b   :  { %v305_v29 = vsel %vm295_vm3, %v302_v19, %v304_v26  ;;  %v309_v30 = vsel %vm295_vm3, %v306_v20, %v308_v27  ;;  %v185_v32 = vshrl.u32 %v1349_v2, %v173_v24  ;;  %v187_v39 = vshll.u32 %v1349_v2, %v172_v16 }
 0x11c   :  { %v1431_v33 = vmul.u32.u64.low %v1410_v58, %v309_v30  ;;  %v1432_v34 = vmul.u32.u64.high %v1410_v58, %v309_v30, %v1431_v33  ;;  %v1435_v35 = vmul.u32.u64.low %v1410_v58, %v305_v29  ;;  %v1436_v37 = vmul.u32.u64.high %v1410_v58, %v305_v29, %v1435_v35 }
 0x11d   :  { %v188_v41 = vshrl.u32 %v1350_v9, %v173_v24  ;;  %v186_v42 = vor.u32 %v185_v32, %v184_v31  ;;  %v175_v44 = vshll.u32 %v1345_v56, %v172_v16  ;;  %v176_v45 = vshrl.u32 %v1346_v60, %v173_v24 }
 0x11e   :  { %v317_v46 = vmul.u32 %v1410_v58, %v301_v25  ;;  %v178_v49 = vshll.u32 %v1346_v60, %v172_v16  ;;  %v179_v50 = vshrl.u32 %v1347_v62, %v173_v24  ;;  %vm319_vm6 = vc.u32 %v1432_v34, %v1435_v35 }
 0x11f   :  { %v189_v47 = vor.u32 %v188_v41, %v187_v39  ;;  %v320_v51 = vadd.s32 1, %v1436_v37  ;;  %vm193_vm7 = vcmp.lt.s32.totalorder %v171_v28, 4  ;;  %v177_v52 = vor.u32 %v176_v45, %v175_v44 }
 0x120   :  { %v180_v54 = vor.u32 %v179_v50, %v178_v49  ;;  %v181_v55 = vshll.u32 %v1347_v62, %v172_v16  ;;  %v182_v57 = vshrl.u32 %v1348_v0, %v173_v24  ;;  %v199_v59 = vsel %vm193_vm7, %v186_v42, 920167782 }
 0x121   :  { %v203_v53 = vsel %vm193_vm7, %v189_v47, 1326507024  ;;  %v321_v58 = vsel %vm319_vm6, %v320_v51, %v1436_v37  ;;  %vm190_vm8 = vcmp.lt.s32.totalorder %v171_v28, 1  ;;  %vm192_vm9 = vcmp.lt.s32.totalorder %v171_v28, 3 }
 0x122   :  { %v322_v61 = vadd.s32 %v321_v58, %v317_v46  ;;  %v183_v63 = vor.u32 %v182_v57, %v181_v55  ;;  %v198_v1 = vsel %vm190_vm8, %v177_v52, %v180_v54  ;;  %v204_v3 = vsel %vm192_vm9, %v186_v42, %v203_v53 }
 0x123   :  { %v174_v4 = vshrl.u32 %v1345_v56, %v173_v24  ;;  %vm191_vm10 = vcmp.lt.s32.totalorder %v171_v28, 2  ;;  %v318_v39 = vadd.s32 %v1435_v35, %v1432_v34 }
 0x124   :  { %v323_v6 = vadd.s32 536870912, %v322_v61  ;;  %v195_v7 = vsel %vm193_vm7, %v183_v63, 2102212464  ;;  %v200_v8 = vsel %vm192_vm9, %v183_v63, %v199_v59  ;;  %v202_v10 = vsel %vm190_vm8, %v180_v54, %v183_v63 }
 0x125   :  { %v194_v11 = vsel %vm190_vm8, %v174_v4, %v177_v52  ;;  %v201_v12 = vsel %vm191_vm10, %v198_v1, %v200_v8  ;;  %v205_v13 = vsel %vm191_vm10, %v202_v10, %v204_v3  ;;  %v196_v15 = vsel %vm192_vm9, %v180_v54, %v195_v7 }
 0x126   :  { %v1457_v14 = vshrl.u32 %v323_v6, 30  ;;  %v1460_v16 = vmul.u32.u64.low %v206_v5, %v205_v13  ;;  %v1461_v17 = vmul.u32.u64.high %v206_v5, %v205_v13, %v1460_v16  ;;  %v197_v21 = vsel %vm191_vm10, %v194_v11, %v196_v15 }
 0x127   :  { %v1463_v18 = vmul.u32.u64.low %v206_v5, %v201_v12  ;;  %v1464_v19 = vmul.u32.u64.high %v206_v5, %v201_v12, %v1463_v18  ;;  %v213_v25 = vmul.u32 %v206_v5, %v197_v21  ;;  %vm354_vm8 = vweird.f32 %v1395_v36 }
 0x128   :  { %v325_v20 = vshll.u32 %v1457_v14, 30  ;;  %v348_v15 = vsub.s32 4, %v1457_v14  ;;  %vm250_vm9 = vweird.f32 %v1399_v40 }
 0x129   :  { %vm215_vm11 = vc.u32 %v1461_v17, %v1463_v18  ;;  %v216_v23 = vadd.s32 1, %v1464_v19  ;;  %v214_v34 = vadd.s32 %v1463_v18, %v1461_v17 }
 0x12a   :  { %v326_v22 = vsub.s32 %v322_v61, %v325_v20  ;;  %v349_v18 = vsel %vm264_vm14, %v348_v15, %v1457_v14 }
 0x12b   :  { %v217_v26 = vsel %vm215_vm11, %v216_v23, %v1464_v19  ;;  %v351_v21 = vsel %vm1477_vm15, 0, %v349_v18 }
 0x12c   :  { %v328_v24 = vsub.s32 0, %v326_v22  ;;  %v218_v28 = vadd.s32 %v217_v26, %v213_v25  ;;  %v355_v23 = vadd.s32 3, %v351_v21 }
 0x12e   :  { %v1020_v27 = vmin.u32 %v328_v24, %v326_v22  ;;  %v219_v30 = vadd.s32 536870912, %v218_v28 }
 0x130   :  { %v330_v29 = vclz %v1020_v27  ;;  %v220_v32 = vshrl.u32 %v219_v30, 30 }
 0x132   :  { %v1021_v31 = vadd.s32 4294967294, %v330_v29  ;;  %v221_v33 = vshll.u32 %v220_v32, 30  ;;  %v244_v38 = vsub.s32 4, %v220_v32 }
 0x134   :  { %vm1022_vm12 = vcmp.lt.s32.totalorder %v1021_v31, 0  ;;  %v222_v43 = vsub.s32 %v218_v28, %v221_v33  ;;  %v356_v28 = vand.u32 3, %v355_v23 }
 0x135   :  { %v333_v37 = vsel %vm1022_vm12, 0, %v1021_v31 }
 0x136   :  { %v334_v41 = vsub.s32 32, %v333_v37  ;;  %v338_v42 = vsub.s32 4294967266, %v333_v37  ;;  %v335_v44 = vshll.u32 %v326_v22, %v333_v37  ;;  %v224_v47 = vsub.s32 0, %v222_v43 }
 0x137   :  { %v245_v22 = vsel %vm160_vm0, %v244_v38, %v220_v32  ;;  %vm358_vm2 = vcmp.eq.s32.totalorder %v356_v28, 0  ;;  %vm361_vm3 = vcmp.eq.s32.totalorder %v356_v28, 2  ;;  %vm357_vm4 = vcmp.lt.s32.totalorder %v356_v28, 2 }
 0x138   :  { %v336_v45 = vshrl.u32 %v318_v39, %v334_v41  ;;  %v339_v46 = vadd.s32 127, %v338_v42  ;;  %v1016_v51 = vmin.u32 %v224_v47, %v222_v43  ;;  %v247_v25 = vsel %vm159_vm1, 0, %v245_v22 }
 0x139   :  { %v251_v27 = vadd.s32 3, %v247_v25 }
 0x13a   :  { %v337_v49 = vor.u32 %v336_v45, %v335_v44  ;;  %v340_v50 = vshll.u32 %v339_v46, 23  ;;  %v226_v53 = vclz %v1016_v51  ;;  %v366_v46 = vstv %s157_s29  ;;  %v697_v51 = vld [vmem:[#allocation7 + $0x178] sm:$0xff] }
 0x13b   :  { %v252_v30 = vand.u32 3, %v251_v27  ;;  %1169 = vmatprep.subr.mxu0 %v697_v51 }
 0x13c   :  { %v341_v52 = vor.u32 4788187, %v340_v50  ;;  %v344_v55 = vcvt.s32.f32 %v337_v49  ;;  %v1017_v57 = vadd.s32 4294967294, %v226_v53  ;;  %1170 = vmatpush3.msra.mxu0 %v697_v51  ;;  %v695_v53 = vld [vmem:[#allocation7 + $0x168] sm:$0xff] }
 0x13d   :  { %vm257_vm5 = vcmp.eq.s32.totalorder %v252_v30, 2  ;;  %vm254_vm6 = vcmp.eq.s32.totalorder %v252_v30, 0  ;;  %vm253_vm7 = vcmp.lt.s32.totalorder %v252_v30, 2 }
 0x13e   :  { %v342_v54 = vand.u32 2147483647, %v341_v52  ;;  %vm1018_vm13 = vcmp.lt.s32.totalorder %v1017_v57, 0  ;;  %v696_v52 = vld [vmem:[#allocation7 + $0x170] sm:$0xff] }
 0x13f   :  { %v229_v59 = vsel %vm1018_vm13, 0, %v1017_v57  ;;  %1171 = vmatprep.subr.mxu0 %v696_v52  ;;  %v690_v57 = vld [vmem:[#allocation7 + $0x140] sm:$0xff] }
 0x140   :  { %v345_v58 = vmul.f32 %v344_v55, %v342_v54  ;;  %v230_v35 = vsub.s32 32, %v229_v59  ;;  %v234_v63 = vsub.s32 4294967266, %v229_v59  ;;  %v231_v3 = vshll.u32 %v222_v43, %v229_v59  ;;  %1172 = vmatpush3.msra.mxu0 %v696_v52  ;;  %v692_v54 = vld [vmem:[#allocation7 + $0x150] sm:$0xff]  ;;  %v691_v55 = vld [vmem:[#allocation7 + $0x148] sm:$0xff] }
 0x141   :  { %1173 = vmatprep.subr.mxu0 %v695_v53  ;;  %v688_v59 = vld [vmem:[#allocation7 + $0x130] sm:$0xff] }
 0x142   :  { %v346_v61 = vxor.u32 2147483648, %v345_v58  ;;  %v232_v4 = vshrl.u32 %v214_v34, %v230_v35  ;;  %v235_v5 = vadd.s32 127, %v234_v63  ;;  %1174 = vmatpush3.msra.mxu0 %v695_v53  ;;  %v686_v34 = vld [vmem:[#allocation7 + $0x120] sm:$0xff]  ;;  %v685_v35 = vld [vmem:[#allocation7 + $0x118] sm:$0xff]  ;;  %v684_v63 = vld [vmem:[#allocation7 + $0x110] sm:$0xff] }
 0x144   :  { %v347_v1 = vsel %vm264_vm14, %v346_v61, %v345_v58  ;;  %v233_v7 = vor.u32 %v232_v4, %v231_v3  ;;  %v236_v8 = vshll.u32 %v235_v5, 23  ;;  %v689_v58 = vld [vmem:[#allocation7 + $0x138] sm:$0xff]  ;;  %v687_v61 = vld [vmem:[#allocation7 + $0x128] sm:$0xff]  ;;  %v682_v3 = vld [vmem:[#allocation7 + $0x100] sm:$0xff] }
 0x145   :  { %v350_v10 = vsel %vm1477_vm15, %v1395_v36, %v347_v1  ;;  %v694_v36 = vld [vmem:[#allocation7 + $0x160] sm:$0xff]  ;;  %v683_v1 = vld [vmem:[#allocation7 + $0x108] sm:$0xff] }
 0x146   :  { %v237_v11 = vor.u32 4788187, %v236_v8  ;;  %1240 = vcosq.f32 %v350_v10  ;;  %v240_v13 = vcvt.s32.f32 %v233_v7  ;;  %1175 = vmatprep.subr.mxu0 %v694_v36  ;;  %v1024_v4 = vld [vmem:[%s1680_s3 + $0x1] ss:$0 sm:$0xff] }
 0x147   :  { %1242 = vsinq.f32 %v350_v10  ;;  %1176 = vmatpush3.msra.mxu0 %v694_v36 }
 0x148   :  { %v238_v12 = vand.u32 2147483647, %v237_v11 }
 0x14a   :  { %v241_v16 = vmul.f32 %v240_v13, %v238_v12 }
 0x14c   :  { %v242_v17 = vxor.u32 2147483648, %v241_v16 }
 0x14e   :  { %v243_v19 = vsel %vm160_vm0, %v242_v17, %v241_v16 }
 0x14f   :  { %v246_v20 = vsel %vm159_vm1, %v1399_v40, %v243_v19  ;;  %v693_v40 = vld [vmem:[#allocation7 + $0x158] sm:$0xff] }
 0x150   :  { %1244 = vcosq.f32 %v246_v20  ;;  %1177 = vmatprep.subr.mxu0 %v693_v40 }
 0x151   :  { %1246 = vsinq.f32 %v246_v20  ;;  %1178 = vmatpush3.msra.mxu0 %v693_v40 }
 0x152   :  { %1179 = vmatprep.subr.mxu0 %v692_v54 }
 0x153   :  { %v1241_v24 = vpop.eup %1240  ;;  %1180 = vmatpush3.msra.mxu0 %v692_v54 }
 0x154   :  { %v1243_v26 = vpop.eup %1242  ;;  %v362_v14 = vxor.u32 2147483648, %v1241_v24  ;;  %1181 = vmatprep.subr.mxu0 %v691_v55 }
 0x155   :  { %v359_v29 = vxor.u32 2147483648, %v1243_v26  ;;  %1182 = vmatpush3.msra.mxu0 %v691_v55 }
 0x156   :  { %v363_v31 = vsel %vm361_vm3, %v362_v14, %v1243_v26  ;;  %1183 = vmatprep.subr.mxu0 %v690_v57 }
 0x157   :  { %v360_v48 = vsel %vm358_vm2, %v1241_v24, %v359_v29  ;;  %1184 = vmatpush3.msra.mxu0 %v690_v57 }
 0x158   :  { %v364_v41 = vsel %vm357_vm4, %v360_v48, %v363_v31  ;;  %1185 = vmatprep.subr.mxu0 %v689_v58 }
 0x159   :  { %v365_v45 = vsel %vm354_vm8, nan, %v364_v41  ;;  %1186 = vmatpush3.msra.mxu0 %v689_v58 }
 0x15a   :  { %v368_v50 = vmul.f32 %v366_v46, %v365_v45  ;;  %1187 = vmatprep.subr.mxu0 %v688_v59 }
 0x15b   :  { %1188 = vmatpush3.msra.mxu0 %v688_v59 }
 0x15c   :  { %1189 = vmatprep.subr.mxu0 %v687_v61 }
 0x15d   :  { %v1245_v33 = vpop.eup %1244  ;;  %1190 = vmatpush3.msra.mxu0 %v687_v61 }
 0x15e   :  { %v1247_v37 = vpop.eup %1246  ;;  %v258_v39 = vxor.u32 2147483648, %v1245_v33  ;;  %1191 = vmatprep.subr.mxu0 %v686_v34 }
 0x15f   :  { %v255_v32 = vxor.u32 2147483648, %v1247_v37  ;;  %1192 = vmatpush3.msra.mxu0 %v686_v34 }
 0x160   :  { %v259_v42 = vsel %vm257_vm5, %v258_v39, %v1247_v37  ;;  %1193 = vmatprep.subr.mxu0 %v685_v35 }
 0x161   :  { %v256_v43 = vsel %vm254_vm6, %v1245_v33, %v255_v32  ;;  %1194 = vmatpush3.msra.mxu0 %v685_v35 }
 0x162   :  { %v260_v44 = vsel %vm253_vm7, %v256_v43, %v259_v42  ;;  %1195 = vmatprep.subr.mxu0 %v684_v63 }
 0x163   :  { %v261_v47 = vsel %vm250_vm9, nan, %v260_v44  ;;  %1196 = vmatpush3.msra.mxu0 %v684_v63 }
 0x164   :  { %v367_v49 = vmul.f32 %v366_v46, %v261_v47  ;;  %1197 = vmatprep.subr.mxu0 %v683_v1 }
 0x165   :  { %1198 = vmatpush3.msra.mxu0 %v683_v1 }
 0x166   :  { %1166 = vmatprep.mubr.f32.mxu1 %v367_v49  ;;  %1199 = vmatprep.subr.mxu0 %v682_v3 }
 0x167   :  { %1167 = vmatmul.mubr.f32.vlgmr.msra.gmra.mxu1 %v368_v50  ;;  %1200 = vmatpush3.msra.mxu0 %v682_v3 }
 0x227   :  { %v1168_v5 = vpop.f32.mrf.mxu1 }
 0x228   :  { %v1499_v6 = vadd.f32 %v1168_v5, %v1024_v4 }
 0x229   :  { %v460_v7 = vpop.f32.mrf.mxu1 }
 0x22a   :  { %v574_v8 = vand.u32 2147483647, %v1499_v6  ;;  %v577_v10 = vand.u32 2139095040, %v1499_v6  ;;  %v1503_v11 = vadd.f32 %v1024_v4, %v460_v7  ;;  %vm576_vm8 = vcmp.lt.s32.totalorder %v1499_v6, 0 }
 0x22c   :  { %v578_v12 = vshrl.u32 %v577_v10, 23  ;;  %v581_v13 = vand.u32 8388607, %v574_v8  ;;  %v473_v15 = vand.u32 2139095040, %v1503_v11  ;;  %v470_v17 = vand.u32 2147483647, %v1503_v11 }
 0x22d   :  { %vm1571_vm9 = vcmp.le.f32.partialorder %v574_v8, 0.7853982 }
 0x22e   :  { %v1030_v16 = vadd.s32 4294967169, %v578_v12  ;;  %v474_v38 = vshrl.u32 %v473_v15, 23  ;;  %v582_v19 = vor.u32 8388608, %v581_v13  ;;  %v477_v21 = vand.u32 8388607, %v470_v17 }
 0x230   :  { %v584_v18 = vadd.s32 1, %v1030_v16  ;;  %v1026_v20 = vadd.s32 4294967169, %v474_v38  ;;  %v1511_v26 = vshll.u32 %v582_v19, 8  ;;  %v478_v29 = vor.u32 8388608, %v477_v21 }
 0x232   :  { %vm585_vm10 = vcmp.gt.s32.totalorder %v584_v18, 0  ;;  %v480_v23 = vadd.s32 1, %v1026_v20  ;;  %v518_v61 = vshll.u32 %v478_v29, 8 }
 0x233   :  { %v586_v22 = vsel %vm585_vm10, %v584_v18, 0  ;;  %vm472_vm10 = vcmp.lt.s32.totalorder %v1503_v11, 0 }
 0x234   :  { %v587_v24 = vshrl.u32 %v586_v22, 5  ;;  %v588_v25 = vand.u32 31, %v586_v22  ;;  %vm481_vm11 = vcmp.gt.s32.totalorder %v480_v23, 0 }
 0x235   :  { %v482_v46 = vsel %vm481_vm11, %v480_v23, 0  ;;  %vm471_vm11 = vcmp.le.f32.partialorder %v470_v17, 0.7853982 }
 0x236   :  { %v589_v27 = vsub.s32 32, %v588_v25  ;;  %v591_v28 = vshll.u32 %v1345_v56, %v588_v25  ;;  %v594_v14 = vshll.u32 %v1346_v60, %v588_v25  ;;  %v597_v30 = vshll.u32 %v1347_v62, %v588_v25 }
 0x237   :  { %v600_v48 = vshll.u32 %v1348_v0, %v588_v25  ;;  %v603_v31 = vshll.u32 %v1349_v2, %v588_v25  ;;  %vm606_vm12 = vcmp.lt.s32.totalorder %v587_v24, 1  ;;  %vm608_vm13 = vcmp.lt.s32.totalorder %v587_v24, 3 }
 0x238   :  { %v592_v33 = vshrl.u32 %v1346_v60, %v589_v27  ;;  %v595_v37 = vshrl.u32 %v1347_v62, %v589_v27  ;;  %v598_v39 = vshrl.u32 %v1348_v0, %v589_v27  ;;  %v590_v32 = vshrl.u32 %v1345_v56, %v589_v27 }
 0x239   :  { %v601_v41 = vshrl.u32 %v1349_v2, %v589_v27  ;;  %v604_v42 = vshrl.u32 %v1350_v9, %v589_v27  ;;  %vm609_vm14 = vcmp.lt.s32.totalorder %v587_v24, 4  ;;  %v484_v50 = vand.u32 31, %v482_v46 }
 0x23a   :  { %v593_v43 = vor.u32 %v592_v33, %v591_v28  ;;  %v596_v44 = vor.u32 %v595_v37, %v594_v14  ;;  %v599_v45 = vor.u32 %v598_v39, %v597_v30  ;;  %vm607_vm15 = vcmp.lt.s32.totalorder %v587_v24, 2 }
 0x23b   :  { %v602_v47 = vor.u32 %v601_v41, %v600_v48  ;;  %v605_v49 = vor.u32 %v604_v42, %v603_v31  ;;  %v485_v57 = vsub.s32 32, %v484_v50  ;;  %v483_v1 = vshrl.u32 %v482_v46, 5 }
 0x23c   :  { %v610_v51 = vsel %vm606_vm12, %v590_v32, %v593_v43  ;;  %v611_v52 = vsel %vm609_vm14, %v599_v45, 2102212464  ;;  %v614_v53 = vsel %vm606_vm12, %v593_v43, %v596_v44  ;;  %v618_v36 = vsel %vm606_vm12, %v596_v44, %v599_v45 }
 0x23d   :  { %v612_v40 = vsel %vm608_vm13, %v596_v44, %v611_v52  ;;  %v615_v54 = vsel %vm609_vm14, %v602_v47, 920167782  ;;  %v619_v55 = vsel %vm609_vm14, %v605_v49, 1326507024  ;;  %v487_v10 = vshll.u32 %v1345_v56, %v484_v50 }
 0x23e   :  { %v616_v58 = vsel %vm608_vm13, %v599_v45, %v615_v54  ;;  %v620_v59 = vsel %vm608_vm13, %v602_v47, %v619_v55  ;;  %v613_v34 = vsel %vm607_vm15, %v610_v51, %v612_v40  ;;  %v488_v12 = vshrl.u32 %v1346_v60, %v485_v57 }
 0x23f   :  { %v617_v35 = vsel %vm607_vm15, %v614_v53, %v616_v58  ;;  %v621_v63 = vsel %vm607_vm15, %v618_v36, %v620_v59  ;;  %v490_v13 = vshll.u32 %v1346_v60, %v484_v50  ;;  %v491_v15 = vshrl.u32 %v1347_v62, %v485_v57 }
 0x240   :  { %v1532_v3 = vmul.u32.u64.low %v1511_v26, %v621_v63  ;;  %v1533_v4 = vmul.u32.u64.high %v1511_v26, %v621_v63, %v1532_v3  ;;  %v1536_v5 = vmul.u32.u64.low %v1511_v26, %v617_v35  ;;  %v1537_v7 = vmul.u32.u64.high %v1511_v26, %v617_v35, %v1536_v5 }
 0x241   :  { %v493_v16 = vshll.u32 %v1347_v62, %v484_v50  ;;  %v494_v38 = vshrl.u32 %v1348_v0, %v485_v57  ;;  %v496_v18 = vshll.u32 %v1348_v0, %v484_v50  ;;  %v497_v19 = vshrl.u32 %v1349_v2, %v485_v57 }
 0x242   :  { %v489_v20 = vor.u32 %v488_v12, %v487_v10  ;;  %v492_v21 = vor.u32 %v491_v15, %v490_v13  ;;  %v499_v22 = vshll.u32 %v1349_v2, %v484_v50  ;;  %v500_v23 = vshrl.u32 %v1350_v9, %v485_v57 }
 0x243   :  { %v629_v24 = vmul.u32 %v1511_v26, %v613_v34  ;;  %vm631_vm0 = vc.u32 %v1533_v4, %v1536_v5  ;;  %v632_v25 = vadd.s32 1, %v1537_v7  ;;  %v495_v27 = vor.u32 %v494_v38, %v493_v16 }
 0x244   :  { %v486_v28 = vshrl.u32 %v1345_v56, %v485_v57  ;;  %v498_v29 = vor.u32 %v497_v19, %v496_v18  ;;  %v501_v14 = vor.u32 %v500_v23, %v499_v22  ;;  %vm502_vm1 = vcmp.lt.s32.totalorder %v483_v1, 1 }
 0x245   :  { %v633_v30 = vsel %vm631_vm0, %v632_v25, %v1537_v7  ;;  %vm504_vm2 = vcmp.lt.s32.totalorder %v483_v1, 3  ;;  %vm505_vm3 = vcmp.lt.s32.totalorder %v483_v1, 4  ;;  %v510_v48 = vsel %vm502_vm1, %v489_v20, %v492_v21 }
 0x246   :  { %v634_v31 = vadd.s32 %v633_v30, %v629_v24  ;;  %v507_v33 = vsel %vm505_vm3, %v495_v27, 2102212464  ;;  %v511_v37 = vsel %vm505_vm3, %v498_v29, 920167782  ;;  %v514_v26 = vsel %vm502_vm1, %v492_v21, %v495_v27 }
 0x247   :  { %vm503_vm4 = vcmp.lt.s32.totalorder %v483_v1, 2  ;;  %v506_v39 = vsel %vm502_vm1, %v486_v28, %v489_v20  ;;  %v512_v32 = vsel %vm504_vm2, %v495_v27, %v511_v37  ;;  %v515_v41 = vsel %vm505_vm3, %v501_v14, 1326507024 }
 0x248   :  { %v635_v42 = vadd.s32 536870912, %v634_v31  ;;  %v508_v43 = vsel %vm504_vm2, %v492_v21, %v507_v33  ;;  %v513_v44 = vsel %vm503_vm4, %v510_v48, %v512_v32  ;;  %v516_v45 = vsel %vm504_vm2, %v498_v29, %v515_v41 }
 0x249   :  { %v517_v46 = vsel %vm503_vm4, %v514_v26, %v516_v45  ;;  %v1556_v47 = vmul.u32.u64.low %v518_v61, %v513_v44  ;;  %v1557_v49 = vmul.u32.u64.high %v518_v61, %v513_v44, %v1556_v47  ;;  %v509_v53 = vsel %vm503_vm4, %v506_v39, %v508_v43 }
 0x24a   :  { %v636_v50 = vshrl.u32 %v635_v42, 30  ;;  %v1559_v51 = vmul.u32.u64.low %v518_v61, %v517_v46  ;;  %v1560_v52 = vmul.u32.u64.high %v518_v61, %v517_v46, %v1559_v51  ;;  %v525_v55 = vmul.u32 %v518_v61, %v509_v53 }
 0x24b   :  { %v528_v40 = vadd.s32 1, %v1557_v49  ;;  %v630_v13 = vadd.s32 %v1536_v5, %v1533_v4  ;;  %vm666_vm2 = vweird.f32 %v1499_v6  ;;  %vm562_vm3 = vweird.f32 %v1503_v11 }
 0x24c   :  { %v637_v36 = vshll.u32 %v636_v50, 30  ;;  %vm527_vm5 = vc.u32 %v1560_v52, %v1556_v47  ;;  %v526_v30 = vadd.s32 %v1556_v47, %v1560_v52  ;;  %v660_v46 = vsub.s32 4, %v636_v50 }
 0x24d   :  { %v529_v57 = vsel %vm527_vm5, %v528_v40, %v1557_v49 }
 0x24e   :  { %v638_v54 = vsub.s32 %v634_v31, %v637_v36  ;;  %v530_v59 = vadd.s32 %v529_v57, %v525_v55  ;;  %v661_v51 = vsel %vm576_vm8, %v660_v46, %v636_v50 }
 0x24f   :  { %v663_v36 = vsel %vm1571_vm9, 0, %v661_v51 }
 0x250   :  { %v640_v58 = vsub.s32 0, %v638_v54  ;;  %v531_v35 = vadd.s32 536870912, %v530_v59 }
 0x252   :  { %v1031_v34 = vmin.u32 %v640_v58, %v638_v54  ;;  %v532_v1 = vshrl.u32 %v531_v35, 30 }
 0x254   :  { %v642_v63 = vclz %v1031_v34  ;;  %v533_v7 = vshll.u32 %v532_v1, 30  ;;  %v556_v8 = vsub.s32 4, %v532_v1 }
 0x256   :  { %v1032_v3 = vadd.s32 4294967294, %v642_v63  ;;  %v534_v10 = vsub.s32 %v530_v59, %v533_v7  ;;  %v557_v40 = vsel %vm472_vm10, %v556_v8, %v532_v1 }
 0x257   :  { %v559_v57 = vsel %vm471_vm11, 0, %v557_v40 }
 0x258   :  { %vm1033_vm6 = vcmp.lt.s32.totalorder %v1032_v3, 0  ;;  %v536_v16 = vsub.s32 0, %v534_v10  ;;  %v563_v50 = vadd.s32 3, %v559_v57 }
 0x259   :  { %v645_v12 = vsel %vm1033_vm6, 0, %v1032_v3 }
 0x25a   :  { %v646_v15 = vsub.s32 32, %v645_v12  ;;  %v650_v61 = vsub.s32 4294967266, %v645_v12  ;;  %v647_v38 = vshll.u32 %v638_v54, %v645_v12  ;;  %v1027_v20 = vmin.u32 %v536_v16, %v534_v10 }
 0x25b   :  { %v667_v54 = vadd.s32 3, %v663_v36  ;;  %v564_v63 = vand.u32 3, %v563_v50 }
 0x25c   :  { %v648_v18 = vshrl.u32 %v630_v13, %v646_v15  ;;  %v651_v19 = vadd.s32 127, %v650_v61  ;;  %v538_v23 = vclz %v1027_v20 }
 0x25d   :  { %v668_v59 = vand.u32 3, %v667_v54  ;;  %vm569_vm15 = vcmp.eq.s32.totalorder %v564_v63, 2  ;;  %vm566_vm0 = vcmp.eq.s32.totalorder %v564_v63, 0  ;;  %vm565_vm1 = vcmp.lt.s32.totalorder %v564_v63, 2 }
 0x25e   :  { %v649_v21 = vor.u32 %v648_v18, %v647_v38  ;;  %v652_v22 = vshll.u32 %v651_v19, 23  ;;  %v1028_v25 = vadd.s32 4294967294, %v538_v23  ;;  %v678_v18 = vstv %s1025_s6 }
 0x25f   :  { %vm670_vm12 = vcmp.eq.s32.totalorder %v668_v59, 0  ;;  %vm673_vm13 = vcmp.eq.s32.totalorder %v668_v59, 2  ;;  %vm669_vm14 = vcmp.lt.s32.totalorder %v668_v59, 2 }
 0x260   :  { %v653_v24 = vor.u32 4788187, %v652_v22  ;;  %v656_v28 = vcvt.s32.f32 %v649_v21  ;;  %vm1029_vm7 = vcmp.lt.s32.totalorder %v1028_v25, 0  ;;  %v1035_v22 = vld [vmem:[%s1680_s3 + $0x2] ss:$0 sm:$0xff]  ;;  %s1665_s3 = sld [smem:[#allocation2 + $0x2]] }
 0x261   :  { %v541_v29 = vsel %vm1029_vm7, 0, %v1028_v25 }
 0x262   :  { %v654_v27 = vand.u32 2147483647, %v653_v24  ;;  %v542_v4 = vsub.s32 32, %v541_v29  ;;  %v546_v5 = vsub.s32 4294967266, %v541_v29  ;;  %v543_v31 = vshll.u32 %v534_v10, %v541_v29 }
 0x264   :  { %v657_v14 = vmul.f32 %v656_v28, %v654_v27  ;;  %v544_v33 = vshrl.u32 %v526_v30, %v542_v4  ;;  %v547_v37 = vadd.s32 127, %v546_v5 }
 0x266   :  { %v658_v48 = vxor.u32 2147483648, %v657_v14  ;;  %v545_v32 = vor.u32 %v544_v33, %v543_v31  ;;  %v548_v41 = vshll.u32 %v547_v37, 23 }
 0x268   :  { %v659_v39 = vsel %vm576_vm8, %v658_v48, %v657_v14  ;;  %v549_v43 = vor.u32 4788187, %v548_v41  ;;  %v552_v45 = vcvt.s32.f32 %v545_v32 }
 0x269   :  { %v662_v42 = vsel %vm1571_vm9, %v1499_v6, %v659_v39 }
 0x26a   :  { %1248 = vcosq.f32 %v662_v42  ;;  %v550_v44 = vand.u32 2147483647, %v549_v43 }
 0x26b   :  { %1250 = vsinq.f32 %v662_v42 }
 0x26c   :  { %v553_v47 = vmul.f32 %v552_v45, %v550_v44 }
 0x26e   :  { %v554_v49 = vxor.u32 2147483648, %v553_v47 }
 0x270   :  { %v555_v52 = vsel %vm472_vm10, %v554_v49, %v553_v47 }
 0x271   :  { %v558_v53 = vsel %vm471_vm11, %v1503_v11, %v555_v52 }
 0x272   :  { %1252 = vcosq.f32 %v558_v53 }
 0x273   :  { %1254 = vsinq.f32 %v558_v53 }
 0x277   :  { %v1249_v55 = vpop.eup %1248 }
 0x278   :  { %v1251_v58 = vpop.eup %1250  ;;  %v674_v35 = vxor.u32 2147483648, %v1249_v55 }
 0x279   :  { %v671_v34 = vxor.u32 2147483648, %v1251_v58 }
 0x27a   :  { %v675_v3 = vsel %vm673_vm13, %v674_v35, %v1251_v58 }
 0x27b   :  { %v672_v17 = vsel %vm670_vm12, %v1249_v55, %v671_v34 }
 0x27c   :  { %v676_v1 = vsel %vm669_vm14, %v672_v17, %v675_v3 }
 0x27d   :  { %v677_v38 = vsel %vm666_vm2, nan, %v676_v1 }
 0x27e   :  { %v680_v21 = vmul.f32 %v678_v18, %v677_v38 }
 0x27f   :  { %v1253_v7 = vpop.eup %1252 }
 0x280   :  { %v1255_v10 = vpop.eup %1254  ;;  %v570_v12 = vxor.u32 2147483648, %v1253_v7 }
 0x281   :  { %v567_v13 = vxor.u32 2147483648, %v1255_v10 }
 0x282   :  { %v571_v15 = vsel %vm569_vm15, %v570_v12, %v1255_v10 }
 0x283   :  { %v568_v61 = vsel %vm566_vm0, %v1253_v7, %v567_v13 }
 0x284   :  { %v572_v16 = vsel %vm565_vm1, %v568_v61, %v571_v15 }
 0x285   :  { %v573_v19 = vsel %vm562_vm3, nan, %v572_v16 }
 0x286   :  { %v679_v20 = vmul.f32 %v678_v18, %v573_v19 }
 0x288   :  { %1201 = vmatprep.mubr.f32.mxu0 %v679_v20 }
 0x289   :  { %1202 = vmatmul.mubr.f32.vlgmr.msra.gmra.mxu0 %v680_v21 }
 0x349   :  { %v1203_v23 = vpop.f32.mrf.mxu0 }
 0x34a   :  { %v1589_v24 = vadd.f32 %v1203_v23, %v1035_v22 }
 0x34b   :  { %v772_v25 = vpop.f32.mrf.mxu0 }
 0x34c   :  { %v886_v6 = vand.u32 2147483647, %v1589_v24  ;;  %v889_v11 = vand.u32 2139095040, %v1589_v24  ;;  %v1593_v27 = vadd.f32 %v1035_v22, %v772_v25  ;;  %vm888_vm2 = vcmp.lt.s32.totalorder %v1589_v24, 0 }
 0x34e   :  { %v890_v28 = vshrl.u32 %v889_v11, 23  ;;  %v893_v29 = vand.u32 8388607, %v886_v6  ;;  %v785_v14 = vand.u32 2139095040, %v1593_v27  ;;  %v782_v4 = vand.u32 2147483647, %v1593_v27 }
 0x34f   :  { %vm887_vm3 = vcmp.le.f32.partialorder %v886_v6, 0.7853982 }
 0x350   :  { %v1041_v30 = vadd.s32 4294967169, %v890_v28  ;;  %v786_v5 = vshrl.u32 %v785_v14, 23  ;;  %v894_v31 = vor.u32 8388608, %v893_v29  ;;  %v789_v37 = vand.u32 8388607, %v782_v4 }
 0x352   :  { %v896_v48 = vadd.s32 1, %v1041_v30  ;;  %v1037_v33 = vadd.s32 4294967169, %v786_v5  ;;  %v1601_v42 = vshll.u32 %v894_v31, 8  ;;  %v790_v45 = vor.u32 8388608, %v789_v37 }
 0x354   :  { %vm897_vm4 = vcmp.gt.s32.totalorder %v896_v48, 0  ;;  %v792_v39 = vadd.s32 1, %v1037_v33  ;;  %v830_v16 = vshll.u32 %v790_v45, 8 }
 0x355   :  { %v898_v26 = vsel %vm897_vm4, %v896_v48, 0  ;;  %vm784_vm4 = vcmp.lt.s32.totalorder %v1593_v27, 0 }
 0x356   :  { %v899_v32 = vshrl.u32 %v898_v26, 5  ;;  %v900_v41 = vand.u32 31, %v898_v26  ;;  %vm793_vm5 = vcmp.gt.s32.totalorder %v792_v39, 0 }
 0x357   :  { %v794_v50 = vsel %vm793_vm5, %v792_v39, 0  ;;  %vm783_vm5 = vcmp.le.f32.partialorder %v782_v4, 0.7853982 }
 0x358   :  { %v901_v43 = vsub.s32 32, %v900_v41  ;;  %v903_v44 = vshll.u32 %v1345_v56, %v900_v41  ;;  %v906_v46 = vshll.u32 %v1346_v60, %v900_v41  ;;  %v909_v47 = vshll.u32 %v1347_v62, %v900_v41 }
 0x359   :  { %v912_v49 = vshll.u32 %v1348_v0, %v900_v41  ;;  %v915_v51 = vshll.u32 %v1349_v2, %v900_v41  ;;  %vm918_vm6 = vcmp.lt.s32.totalorder %v899_v32, 1  ;;  %vm920_vm7 = vcmp.lt.s32.totalorder %v899_v32, 3 }
 0x35a   :  { %v904_v8 = vshrl.u32 %v1346_v60, %v901_v43  ;;  %v907_v52 = vshrl.u32 %v1347_v62, %v901_v43  ;;  %v910_v53 = vshrl.u32 %v1348_v0, %v901_v43  ;;  %v902_v36 = vshrl.u32 %v1345_v56, %v901_v43 }
 0x35b   :  { %v913_v40 = vshrl.u32 %v1349_v2, %v901_v43  ;;  %v916_v54 = vshrl.u32 %v1350_v9, %v901_v43  ;;  %vm921_vm8 = vcmp.lt.s32.totalorder %v899_v32, 4  ;;  %v796_v35 = vand.u32 31, %v794_v50 }
 0x35c   :  { %v905_v55 = vor.u32 %v904_v8, %v903_v44  ;;  %v908_v57 = vor.u32 %v907_v52, %v906_v46  ;;  %v911_v58 = vor.u32 %v910_v53, %v909_v47  ;;  %vm919_vm9 = vcmp.lt.s32.totalorder %v899_v32, 2 }
 0x35d   :  { %v914_v59 = vor.u32 %v913_v40, %v912_v49  ;;  %v917_v34 = vor.u32 %v916_v54, %v915_v51  ;;  %v797_v1 = vsub.s32 32, %v796_v35  ;;  %v795_v20 = vshrl.u32 %v794_v50, 5 }
 0x35e   :  { %v922_v63 = vsel %vm918_vm6, %v902_v36, %v905_v55  ;;  %v923_v17 = vsel %vm921_vm8, %v911_v58, 2102212464  ;;  %v926_v3 = vsel %vm918_vm6, %v905_v55, %v908_v57  ;;  %v930_v7 = vsel %vm918_vm6, %v908_v57, %v911_v58 }
 0x35f   :  { %v924_v10 = vsel %vm920_vm7, %v908_v57, %v923_v17  ;;  %v927_v12 = vsel %vm921_vm8, %v914_v59, 920167782  ;;  %v931_v13 = vsel %vm921_vm8, %v917_v34, 1326507024  ;;  %v799_v11 = vshll.u32 %v1345_v56, %v796_v35 }
 0x360   :  { %v928_v15 = vsel %vm920_vm7, %v911_v58, %v927_v12  ;;  %v932_v61 = vsel %vm920_vm7, %v914_v59, %v931_v13  ;;  %v925_v38 = vsel %vm919_vm9, %v922_v63, %v924_v10  ;;  %v800_v28 = vshrl.u32 %v1346_v60, %v797_v1 }
 0x361   :  { %v929_v18 = vsel %vm919_vm9, %v926_v3, %v928_v15  ;;  %v933_v19 = vsel %vm919_vm9, %v930_v7, %v932_v61  ;;  %v802_v29 = vshll.u32 %v1346_v60, %v796_v35  ;;  %v803_v14 = vshrl.u32 %v1347_v62, %v797_v1 }
 0x362   :  { %v1622_v21 = vmul.u32.u64.low %v1601_v42, %v933_v19  ;;  %v1623_v22 = vmul.u32.u64.high %v1601_v42, %v933_v19, %v1622_v21  ;;  %v1626_v23 = vmul.u32.u64.low %v1601_v42, %v929_v18  ;;  %v1627_v25 = vmul.u32.u64.high %v1601_v42, %v929_v18, %v1626_v23 }
 0x363   :  { %v805_v30 = vshll.u32 %v1347_v62, %v796_v35  ;;  %v806_v5 = vshrl.u32 %v1348_v0, %v797_v1  ;;  %v808_v48 = vshll.u32 %v1348_v0, %v796_v35  ;;  %v809_v31 = vshrl.u32 %v1349_v2, %v797_v1 }
 0x364   :  { %v801_v33 = vor.u32 %v800_v28, %v799_v11  ;;  %v804_v37 = vor.u32 %v803_v14, %v802_v29  ;;  %v811_v26 = vshll.u32 %v1349_v2, %v796_v35  ;;  %v812_v39 = vshrl.u32 %v1350_v9, %v797_v1 }
 0x365   :  { %v941_v32 = vmul.u32 %v1601_v42, %v925_v38  ;;  %vm943_vm10 = vc.u32 %v1623_v22, %v1626_v23  ;;  %v944_v60 = vadd.s32 1, %v1627_v25  ;;  %v807_v62 = vor.u32 %v806_v5, %v805_v30 }
 0x366   :  { %v798_v41 = vshrl.u32 %v1345_v56, %v797_v1  ;;  %v810_v43 = vor.u32 %v809_v31, %v808_v48  ;;  %v813_v0 = vor.u32 %v812_v39, %v811_v26  ;;  %vm814_vm11 = vcmp.lt.s32.totalorder %v795_v20, 1 }
 0x367   :  { %v945_v44 = vsel %vm943_vm10, %v944_v60, %v1627_v25  ;;  %vm816_vm12 = vcmp.lt.s32.totalorder %v795_v20, 3  ;;  %vm817_vm13 = vcmp.lt.s32.totalorder %v795_v20, 4  ;;  %v822_v2 = vsel %vm814_vm11, %v801_v33, %v804_v37 }
 0x368   :  { %v946_v45 = vadd.s32 %v945_v44, %v941_v32  ;;  %v819_v9 = vsel %vm817_vm13, %v807_v62, 2102212464  ;;  %v823_v46 = vsel %vm817_vm13, %v810_v43, 920167782  ;;  %v826_v42 = vsel %vm814_vm11, %v804_v37, %v807_v62 }
 0x369   :  { %vm815_vm14 = vcmp.lt.s32.totalorder %v795_v20, 2  ;;  %v818_v47 = vsel %vm814_vm11, %v798_v41, %v801_v33  ;;  %v824_v49 = vsel %vm816_vm12, %v807_v62, %v823_v46  ;;  %v827_v51 = vsel %vm817_vm13, %v813_v0, 1326507024 }
 0x36a   :  { %v947_v8 = vadd.s32 536870912, %v946_v45  ;;  %v820_v52 = vsel %vm816_vm12, %v804_v37, %v819_v9  ;;  %v825_v53 = vsel %vm815_vm14, %v822_v2, %v824_v49  ;;  %v828_v56 = vsel %vm816_vm12, %v810_v43, %v827_v51 }
 0x36b   :  { %v829_v36 = vsel %vm815_vm14, %v826_v42, %v828_v56  ;;  %v1646_v40 = vmul.u32.u64.low %v830_v16, %v825_v53  ;;  %v1647_v54 = vmul.u32.u64.high %v830_v16, %v825_v53, %v1646_v40  ;;  %v821_v50 = vsel %vm815_vm14, %v818_v47, %v820_v52 }
 0x36c   :  { %v948_v55 = vshrl.u32 %v947_v8, 30  ;;  %v1649_v57 = vmul.u32.u64.low %v830_v16, %v829_v36  ;;  %v1650_v58 = vmul.u32.u64.high %v830_v16, %v829_v36, %v1649_v57  ;;  %v837_v63 = vmul.u32 %v830_v16, %v821_v50 }
 0x36d   :  { %v840_v34 = vadd.s32 1, %v1647_v54  ;;  %v942_v19 = vadd.s32 %v1626_v23, %v1623_v22  ;;  %vm978_vm9 = vweird.f32 %v1589_v24  ;;  %vm874_vm13 = vweird.f32 %v1593_v27 }
 0x36e   :  { %v949_v59 = vshll.u32 %v948_v55, 30  ;;  %vm839_vm15 = vc.u32 %v1650_v58, %v1646_v40  ;;  %v838_v32 = vadd.s32 %v1646_v40, %v1650_v58  ;;  %v972_v0 = vsub.s32 4, %v948_v55 }
 0x36f   :  { %v841_v17 = vsel %vm839_vm15, %v840_v34, %v1647_v54 }
 0x370   :  { %v950_v35 = vsub.s32 %v946_v45, %v949_v59  ;;  %v842_v7 = vadd.s32 %v841_v17, %v837_v63  ;;  %v973_v42 = vsel %vm888_vm2, %v972_v0, %v948_v55  ;;  %v990_v63 = vstv %s1665_s3 }
 0x371   :  { %v975_v8 = vsel %vm887_vm3, 0, %v973_v42 }
 0x372   :  { %v952_v3 = vsub.s32 0, %v950_v35  ;;  %v843_v12 = vadd.s32 536870912, %v842_v7  ;;  %v979_v56 = vadd.s32 3, %v975_v8 }
 0x374   :  { %v1042_v10 = vmin.u32 %v952_v3, %v950_v35  ;;  %v844_v1 = vshrl.u32 %v843_v12, 30  ;;  %v980_v54 = vand.u32 3, %v979_v56 }
 0x376   :  { %v954_v13 = vclz %v1042_v10  ;;  %v845_v61 = vshll.u32 %v844_v1, 30  ;;  %v868_v53 = vsub.s32 4, %v844_v1  ;;  %vm985_vm6 = vcmp.eq.s32.totalorder %v980_v54, 2 }
 0x377   :  { %vm982_vm7 = vcmp.eq.s32.totalorder %v980_v54, 0  ;;  %vm981_vm8 = vcmp.lt.s32.totalorder %v980_v54, 2 }
 0x378   :  { %v1043_v15 = vadd.s32 4294967294, %v954_v13  ;;  %v846_v38 = vsub.s32 %v842_v7, %v845_v61  ;;  %v869_v40 = vsel %vm784_vm4, %v868_v53, %v844_v1 }
 0x379   :  { %v871_v58 = vsel %vm783_vm5, 0, %v869_v40 }
 0x37a   :  { %vm1044_vm0 = vcmp.lt.s32.totalorder %v1043_v15, 0  ;;  %v848_v21 = vsub.s32 0, %v846_v38 }
 0x37b   :  { %v957_v18 = vsel %vm1044_vm0, 0, %v1043_v15 }
 0x37c   :  { %v958_v20 = vsub.s32 32, %v957_v18  ;;  %v962_v16 = vsub.s32 4294967266, %v957_v18  ;;  %v959_v25 = vshll.u32 %v950_v35, %v957_v18  ;;  %v1038_v29 = vmin.u32 %v848_v21, %v846_v38 }
 0x37d   :  { %v875_v35 = vadd.s32 3, %v871_v58 }
 0x37e   :  { %v960_v11 = vshrl.u32 %v942_v19, %v958_v20  ;;  %v963_v28 = vadd.s32 127, %v962_v16  ;;  %v850_v5 = vclz %v1038_v29 }
 0x37f   :  { %v876_v10 = vand.u32 3, %v875_v35 }
 0x380   :  { %v961_v14 = vor.u32 %v960_v11, %v959_v25  ;;  %v964_v30 = vshll.u32 %v963_v28, 23  ;;  %v1039_v31 = vadd.s32 4294967294, %v850_v5 }
 0x381   :  { %vm881_vm10 = vcmp.eq.s32.totalorder %v876_v10, 2  ;;  %vm878_vm11 = vcmp.eq.s32.totalorder %v876_v10, 0  ;;  %vm877_vm12 = vcmp.lt.s32.totalorder %v876_v10, 2 }
 0x382   :  { %v965_v48 = vor.u32 4788187, %v964_v30  ;;  %v968_v37 = vcvt.s32.f32 %v961_v14  ;;  %vm1040_vm1 = vcmp.lt.s32.totalorder %v1039_v31, 0 }
 0x383   :  { %v853_v26 = vsel %vm1040_vm1, 0, %v1039_v31 }
 0x384   :  { %v966_v33 = vand.u32 2147483647, %v965_v48  ;;  %v854_v22 = vsub.s32 32, %v853_v26  ;;  %v858_v23 = vsub.s32 4294967266, %v853_v26  ;;  %v855_v62 = vshll.u32 %v846_v38, %v853_v26 }
 0x386   :  { %v969_v39 = vmul.f32 %v968_v37, %v966_v33  ;;  %v856_v41 = vshrl.u32 %v838_v32, %v854_v22  ;;  %v859_v43 = vadd.s32 127, %v858_v23 }
 0x388   :  { %v970_v60 = vxor.u32 2147483648, %v969_v39  ;;  %v857_v2 = vor.u32 %v856_v41, %v855_v62  ;;  %v860_v45 = vshll.u32 %v859_v43, 23 }
 0x38a   :  { %v971_v44 = vsel %vm888_vm2, %v970_v60, %v969_v39  ;;  %v861_v46 = vor.u32 4788187, %v860_v45  ;;  %v864_v49 = vcvt.s32.f32 %v857_v2 }
 0x38b   :  { %v974_v9 = vsel %vm887_vm3, %v1589_v24, %v971_v44 }
 0x38c   :  { %1256 = vcosq.f32 %v974_v9  ;;  %v862_v47 = vand.u32 2147483647, %v861_v46 }
 0x38d   :  { %1258 = vsinq.f32 %v974_v9 }
 0x38e   :  { %v865_v51 = vmul.f32 %v864_v49, %v862_v47 }
 0x390   :  { %v866_v52 = vxor.u32 2147483648, %v865_v51 }
 0x392   :  { %v867_v36 = vsel %vm784_vm4, %v866_v52, %v865_v51 }
 0x393   :  { %v870_v6 = vsel %vm783_vm5, %v1593_v27, %v867_v36 }
 0x394   :  { %1260 = vcosq.f32 %v870_v6 }
 0x395   :  { %1262 = vsinq.f32 %v870_v6 }
 0x399   :  { %v1257_v55 = vpop.eup %1256 }
 0x39a   :  { %v1259_v57 = vpop.eup %1258  ;;  %v986_v50 = vxor.u32 2147483648, %v1257_v55 }
 0x39b   :  { %v983_v59 = vxor.u32 2147483648, %v1259_v57 }
 0x39c   :  { %v987_v34 = vsel %vm985_vm6, %v986_v50, %v1259_v57 }
 0x39d   :  { %v984_v4 = vsel %vm982_vm7, %v1257_v55, %v983_v59 }
 0x39e   :  { %v988_v17 = vsel %vm981_vm8, %v984_v4, %v987_v34 }
 0x39f   :  { %v989_v3 = vsel %vm978_vm9, nan, %v988_v17 }
 0x3a0   :  { %v992_v7 = vmul.f32 %v990_v63, %v989_v3 }
 0x3a1   :  { %v1261_v12 = vpop.eup %1260 }
 0x3a2   :  { %994 = vst [vmem:[#allocation9 + $0x8] sm:$0xff] %v992_v7  ;;  %v1263_v13 = vpop.eup %1262  ;;  %v882_v1 = vxor.u32 2147483648, %v1261_v12 }
 0x3a3   :  { %v879_v15 = vxor.u32 2147483648, %v1263_v13 }
 0x3a4   :  { %v883_v61 = vsel %vm881_vm10, %v882_v1, %v1263_v13 }
 0x3a5   :  { %v880_v38 = vsel %vm878_vm11, %v1261_v12, %v879_v15 }
 0x3a6   :  { %v884_v18 = vsel %vm877_vm12, %v880_v38, %v883_v61 }
 0x3a7   :  { %v885_v24 = vsel %vm874_vm13, nan, %v884_v18 }
 0x3a8   :  { %v991_v19 = vmul.f32 %v990_v63, %v885_v24 }
 0x3aa   :  { %993 = vst [vmem:[#allocation9] sm:$0xff] %v991_v19 }
 0x3ab   :  { %1323 = shalt.err (!%p1320_p0)
}
 0x3ac   :  { %1006 = dma.vmem_to_hbm [thread:$0]  %s1001_s10, 256, %s1681_s4, [#allocation4], %s1342_s21, %s1342_s21, %s1343_s22  }
 0x3ad   :  { %1338 = dma.done.wait [#allocation4], 256  }
 0x3ae   :  { %1339 = vsyncadd [#allocation4], 4294967040 }
 0x3af   :  { %1010 = vsyncpa [#allocation3], 1 }
 0x3b0   :  { %1011 = vsyncpa [#allocation8], 1 }
 0x3b1   :  { %1012 = vsyncpa [#allocation4], 1 }
 0x3b2   :  { %1013 = vsyncpa [#allocation5], 1 }

</bundles_post_ra>
